<compile_context>
chip_gen: v7x
topology: tpu7x:2x2x1
jax: 0.10.0
libtpu: 0.0.40
codegen_flags: <defaults>
</compile_context>

<pallas_src>
import numpy as np
import jax
import jax.numpy as jnp
from jax import lax
from jax.experimental import pallas as pl
from jax.experimental.pallas import tpu as pltpu

# ----------------------------- lane-layout constants --------------------------
K1 = 256          # merged input width: fs(125) | fc(6) | zero pad
N1 = 256          # stage-1 width: 160 conv1 | 6 FC1 hidden | 10 FC2 hidden | pad
N2 = 128          # stage-2 width: 80 conv2 | 4 "second" | 6 "third" | pad
N3 = 128          # stage-3 width: 60 CNN.fc1 | 10 carried | pad
N4 = 128          # stage-4 width: 40 logits | 10 carried | pad
CONV1_LANES = 160
FC_IN_OFF = 125   # fc lives at input lanes 125:131 of the merged input
FC1H_OFF = 160    # FC1 hidden activations live at lanes 160:166 of h1
FC2H_OFF = 166    # FC2 hidden activations live at lanes 166:176 of h1
NUM_CLASSES = 40
OUT_DIM = 50


def _round_up(n, m):
    return ((n + m - 1) // m) * m


# ------------------------------ Pallas kernel --------------------------------
def frontnet_kernel(x_ref, cmask_ref, lmask_ref,
                    w1_ref, b1_ref, w2_ref, b2_ref,
                    w3_ref, b3_ref, w4_ref, b4_ref,
                    out_ref):
    f32 = jnp.float32
    mxu = w1_ref.dtype          # bf16 for perf, f32 for exact verification

    # --- stage 1: conv1 (NCHW scatter folded into weights) + FC1.fc1 + FC2.fc3 ---
    x = x_ref[...]
    h1 = jnp.dot(x.astype(mxu), w1_ref[...], preferred_element_type=f32) + b1_ref[...]
    h1 = jnp.maximum(h1, 0.0)                                   # (bt, 256), f32

    # --- 2x2 stride-1 max-pool over the conv lanes via XLU rolls + VPU max ---
    # roll(x, k)[i] == x[i-k]  =>  p[i] = max(h1[i], h1[i-1], h1[i-4], h1[i-5]),
    # i.e. the pool window whose bottom-right corner sits at lane i.  Invalid corner
    # lanes have zero rows in W2; FC-branch lanes (>=160) keep un-pooled values via
    # the precomputed conv-lane mask (no per-step iota/compare).
    a = jnp.maximum(h1, pltpu.roll(h1, shift=1, axis=1))
    p = jnp.maximum(a, pltpu.roll(a, shift=4, axis=1))
    cm = cmask_ref[...]                                         # (1, 256): 1 for lane<160
    h1p = h1 + cm * (p - h1)

    # --- stage 2: conv2 + FC1.fc2 + FC2.fc4 (block weights, zero rows elsewhere) ---
    h2 = jnp.dot(h1p.astype(mxu), w2_ref[...], preferred_element_type=f32) + b2_ref[...]
    h2 = jnp.maximum(h2, 0.0)                                   # (bt, 128)

    # --- stage 3: CNN.fc1 + identity carry of the finished FC-branch outputs ---
    h3 = jnp.dot(h2.astype(mxu), w3_ref[...], preferred_element_type=f32) + b3_ref[...]
    h3 = jnp.maximum(h3, 0.0)                                   # (bt, 128)

    # --- stage 4: CNN.fc2 (lanes 0:40) + identity carry (lanes 40:50) ---
    z = jnp.dot(h3.astype(mxu), w4_ref[...], preferred_element_type=f32) + b4_ref[...]

    # log_softmax over lanes 0:40 only; carried lanes 40:50 (and zero pad lanes)
    # pass through untouched.  lm is a precomputed (1,128) {0,1} mask.
    lm = lmask_ref[...]
    zm = z - (1.0 - lm) * 1e30                    # non-logit lanes -> huge negative
    m = jnp.max(zm, axis=-1, keepdims=True)
    e = jnp.exp(zm - m)                           # exp(-1e30) underflows to exactly 0
    lse = jnp.log(jnp.sum(e, axis=-1, keepdims=True))
    out_ref[...] = z - lm * (m + lse)             # lane-dense 128-wide store


# --------------------------- parameter construction --------------------------
def init_params(key):
    """Deterministic PyTorch-default-style init (uniform +-1/sqrt(fan_in))."""
    def u(k, shape, fan_in):
        b = 1.0 / np.sqrt(fan_in)
        return jax.random.uniform(k, shape, jnp.float32, -b, b)

    ks = jax.random.split(key, 16)
    p = {}
    p["W1"], p["b1"] = u(ks[0], (10, 4, 2, 2), 16),  u(ks[1], (10,), 16)    # conv1
    p["W2"], p["b2"] = u(ks[2], (20, 10, 2, 2), 40), u(ks[3], (20,), 40)    # conv2
    p["Wfc1"], p["bfc1"] = u(ks[4], (60, 80), 80), u(ks[5], (60,), 80)      # CNN.fc1
    p["Wfc2"], p["bfc2"] = u(ks[6], (40, 60), 60), u(ks[7], (40,), 60)      # CNN.fc2
    p["A1w"], p["A1b"] = u(ks[8], (6, 6), 6),   u(ks[9], (6,), 6)           # FC1.fc1
    p["A2w"], p["A2b"] = u(ks[10], (4, 6), 6),  u(ks[11], (4,), 6)          # FC1.fc2
    p["C1w"], p["C1b"] = u(ks[12], (10, 25), 25), u(ks[13], (10,), 25)      # FC2.fc3
    p["C2w"], p["C2b"] = u(ks[14], (6, 10), 10),  u(ks[15], (6,), 10)       # FC2.fc4
    return p


def prepare_kernel_params(p, mxu_dtype=jnp.bfloat16):
    """Fused, lane-padded matmul weights.  Weights stored in `mxu_dtype` (bf16 triples
    effective MXU throughput on v6e/v7x and halves HBM/VMEM bytes); biases and masks
    stay f32 (added / selected in f32 on the VPU)."""
    W1 = np.asarray(p["W1"]); b1 = np.asarray(p["b1"])
    W2 = np.asarray(p["W2"]); b2 = np.asarray(p["b2"])

    # stage 1: x(256)=[fs(125)|fc(6)|pad] -> [conv1(160) | FC1.fc1(6) | FC2.fc3(10) | pad]
    # PyTorch scatter: ft_data[:, ic, R, C] = fs[:, 25 + 4*(R*5 + C) + ic]
    W1m = np.zeros((K1, N1), np.float32)
    for oc in range(10):
        for oh in range(4):
            for ow in range(4):
                col = oc * 16 + oh * 4 + ow
                for ic in range(4):
                    for kh in range(2):
                        for kw in range(2):
                            row = 25 + 4 * ((oh + kh) * 5 + (ow + kw)) + ic
                            W1m[row, col] = W1[oc, ic, kh, kw]
    W1m[0:25, FC2H_OFF:FC2H_OFF + 10] = np.asarray(p["C1w"]).T           # fm_d = fs[:, 0:25]
    W1m[FC_IN_OFF:FC_IN_OFF + 6, FC1H_OFF:FC1H_OFF + 6] = np.asarray(p["A1w"]).T  # fc

    b1v = np.zeros((1, N1), np.float32)
    b1v[0, 0:160] = np.repeat(b1, 16)
    b1v[0, FC1H_OFF:FC1H_OFF + 6] = np.asarray(p["A1b"])
    b1v[0, FC2H_OFF:FC2H_OFF + 10] = np.asarray(p["C1b"])

    # stage 2: h1p(256) -> [conv2(80) | second(4) | third(6) | pad]
    # pooled window (r, s) sits at lane ic*16 + (r+1)*4 + (s+1); other rows stay 0,
    # which also neutralizes the roll-wraparound lanes 0..4.
    W2m = np.zeros((N1, N2), np.float32)
    for oc in range(20):
        for oh in range(2):
            for ow in range(2):
                col = oc * 4 + oh * 2 + ow
                for ic in range(10):
                    for kh in range(2):
                        for kw in range(2):
                            row = ic * 16 + (oh + kh + 1) * 4 + (ow + kw + 1)
                            W2m[row, col] = W2[oc, ic, kh, kw]
    W2m[FC1H_OFF:FC1H_OFF + 6, 80:84] = np.asarray(p["A2w"]).T
    W2m[FC2H_OFF:FC2H_OFF + 10, 84:90] = np.asarray(p["C2w"]).T

    b2v = np.zeros((1, N2), np.float32)
    b2v[0, 0:80] = np.repeat(b2, 4)
    b2v[0, 80:84] = np.asarray(p["A2b"])
    b2v[0, 84:90] = np.asarray(p["C2b"])

    # stage 3: CNN.fc1 + identity carry of lanes 80:90 -> 60:70 (relu is a no-op there)
    W3m = np.zeros((N2, N3), np.float32)
    W3m[0:80, 0:60] = np.asarray(p["Wfc1"]).T
    W3m[np.arange(80, 90), np.arange(60, 70)] = 1.0
    b3v = np.zeros((1, N3), np.float32)
    b3v[0, 0:60] = np.asarray(p["bfc1"])

    # stage 4: CNN.fc2 + identity carry of lanes 60:70 -> 40:50
    W4m = np.zeros((N3, N4), np.float32)
    W4m[0:60, 0:40] = np.asarray(p["Wfc2"]).T
    W4m[np.arange(60, 70), np.arange(40, 50)] = 1.0
    b4v = np.zeros((1, N4), np.float32)
    b4v[0, 0:40] = np.asarray(p["bfc2"])

    # precomputed masks (replace per-step broadcasted_iota + compare)
    cmask = np.zeros((1, N1), np.float32); cmask[0, :CONV1_LANES] = 1.0
    lmask = np.zeros((1, N4), np.float32); lmask[0, :NUM_CLASSES] = 1.0

    j = lambda a: jnp.asarray(a, dtype=mxu_dtype)   # matmul weights -> MXU dtype
    f = lambda a: jnp.asarray(a, dtype=jnp.float32) # biases / masks stay f32
    return {"W1": j(W1m), "b1": f(b1v), "W2": j(W2m), "b2": f(b2v),
            "W3": j(W3m), "b3": f(b3v), "W4": j(W4m), "b4": f(b4v),
            "cmask": f(cmask), "lmask": f(lmask)}


# --------------------------------- wrapper -----------------------------------
def frontnet_forward(fs, fc, kp, *, batch_tile=512):
    # TODO(synk): the original .cuda() device transfers have no Pallas equivalent;
    # arrays already live on TPU.
    B = fs.shape[0]

    # merge fc into fs and zero-pad the lane dimension to 256 (clean (8,128) tiles)
    x = jnp.concatenate([fs, fc], axis=1)                   # (B, 131)
    x = jnp.pad(x, ((0, 0), (0, K1 - x.shape[1])))          # (B, 256)

    # batch tiling: single grid step for small B, big M tiles (multiple of 16) for
    # large B; tail rows are zero-padded so arbitrary B works (no divisibility assert).
    bt = max(16, min(batch_tile, _round_up(B, 16)))
    B_pad = _round_up(B, bt)
    if B_pad != B:
        x = jnp.pad(x, ((0, B_pad - B), (0, 0)))
    n_tiles = B_pad // bt

    consts = (kp["cmask"], kp["lmask"],
              kp["W1"], kp["b1"], kp["W2"], kp["b2"],
              kp["W3"], kp["b3"], kp["W4"], kp["b4"])

    in_specs = (
        [pl.BlockSpec((bt, K1), lambda i: (i, 0))]
        # constant block index -> masks/weights stay VMEM-resident across batch tiles
        # (pl.Buffered(1) would additionally drop their second pipeline buffer).
        + [pl.BlockSpec(c.shape, lambda i: (0, 0)) for c in consts]
    )

    flops = 2 * B_pad * (K1 * N1 + N1 * N2 + N2 * N3 + N3 * N4)
    bytes_accessed = int(x.size * x.dtype.itemsize
                         + sum(int(c.size) * c.dtype.itemsize for c in consts)
                         + B_pad * N4 * 4)
    cost = pl.CostEstimate(flops=int(flops),
                           transcendentals=int(B_pad * (N4 + 1)),
                           bytes_accessed=bytes_accessed)

    out = pl.pallas_call(
        frontnet_kernel,
        grid=(n_tiles,),
        in_specs=in_specs,
        # lane-dense 128-wide output; the 50-lane slice happens below in JAX
        out_specs=pl.BlockSpec((bt, N4), lambda i: (i, 0)),
        out_shape=jax.ShapeDtypeStruct((B_pad, N4), jnp.float32),
        compiler_params=pltpu.CompilerParams(
            # v7x: batch tiles shard across the two TensorCores; could be tightened
            # further with pltpu.CORE_PARALLEL / pl.core_map on a 2-TC mesh.
            dimension_semantics=("parallel",)),
        cost_estimate=cost,
    )(x, *consts)

    return out[:B, :OUT_DIM]


# ------------------------------ pure-JAX reference ---------------------------
def frontnet_reference(fs, fc, p):
    B = fs.shape[0]
    fm_d = fs[:, 0:25]
    ft = fs[:, 25:125]
    ft_data = jnp.transpose(ft.reshape(B, 5, 5, 4), (0, 3, 1, 2))  # NCHW (B,4,5,5)

    dn = ("NCHW", "OIHW", "NCHW")
    x = lax.conv_general_dilated(ft_data, p["W1"], (1, 1), "VALID",
                                 dimension_numbers=dn) + p["b1"][None, :, None, None]
    x = jax.nn.relu(x)
    x = lax.reduce_window(x, -jnp.inf, lax.max, (1, 1, 2, 2), (1, 1, 1, 1), "VALID")
    x = lax.conv_general_dilated(x, p["W2"], (1, 1), "VALID",
                                 dimension_numbers=dn) + p["b2"][None, :, None, None]
    x = jax.nn.relu(x)
    x = x.reshape(B, -1)
    x = jax.nn.relu(x @ p["Wfc1"].T + p["bfc1"])
    x = x @ p["Wfc2"].T + p["bfc2"]
    first = jax.nn.log_softmax(x, axis=1)

    second = jax.nn.relu(jax.nn.relu(fc @ p["A1w"].T + p["A1b"]) @ p["A2w"].T + p["A2b"])
    third = jax.nn.relu(jax.nn.relu(fm_d @ p["C1w"].T + p["C1b"]) @ p["C2w"].T + p["C2b"])
    return jnp.concatenate([first, second, third], axis=1)


# ----------------------------------- main -------------------------------------
if __name__ == "__main__":
    key = jax.random.PRNGKey(0)
    k_fs, k_fc, k_param = jax.random.split(key, 3)

    B = 16                                   # small demo batch -> single grid step
    fs = jax.random.normal(k_fs, (B, 125), jnp.float32)
    fc = jax.random.normal(k_fc, (B, 6), jnp.float32)

    params = init_params(k_param)
    ref = jax.block_until_ready(frontnet_reference(fs, fc, params))

    # 1) exact structural check with f32 MXU weights
    kp_f32 = prepare_kernel_params(params, mxu_dtype=jnp.float32)
    out_f32 = jax.block_until_ready(frontnet_forward(fs, fc, kp_f32))
    np.testing.assert_allclose(np.asarray(out_f32), np.asarray(ref), rtol=1e-4, atol=1e-4)

    # 2) performance configuration: bf16 MXU inputs, f32 accumulate/elementwise
    kp_bf16 = prepare_kernel_params(params, mxu_dtype=jnp.bfloat16)
    out = jax.block_until_ready(frontnet_forward(fs, fc, kp_bf16))
    np.testing.assert_allclose(np.asarray(out), np.asarray(ref), rtol=5e-2, atol=5e-2)

    assert out.shape == (B, OUT_DIM) and out.dtype == jnp.float32
    print("KERNEL_OK")
</pallas_src>

<mosaic_0001>
module attributes {stable_mosaic.version = 11 : i64} {
  func.func @frontnet_kernel(%arg0: i32, %arg1: memref<16x256xf32, #tpu.memory_space<vmem>>, %arg2: memref<1x256xf32, #tpu.memory_space<vmem>>, %arg3: memref<1x128xf32, #tpu.memory_space<vmem>>, %arg4: memref<256x256xf32, #tpu.memory_space<vmem>>, %arg5: memref<1x256xf32, #tpu.memory_space<vmem>>, %arg6: memref<256x128xf32, #tpu.memory_space<vmem>>, %arg7: memref<1x128xf32, #tpu.memory_space<vmem>>, %arg8: memref<128x128xf32, #tpu.memory_space<vmem>>, %arg9: memref<1x128xf32, #tpu.memory_space<vmem>>, %arg10: memref<128x128xf32, #tpu.memory_space<vmem>>, %arg11: memref<1x128xf32, #tpu.memory_space<vmem>>, %arg12: memref<16x128xf32, #tpu.memory_space<vmem>>) attributes {dimension_semantics = [#tpu.dimension_semantics<parallel>], iteration_bounds = array<i64: 1>, scalar_prefetch = 0 : i64, scratch_operands = 0 : i64, tpu.core_type = #tpu.core_type<tc>, window_params = [{transform_indices = @transform_0, window_bounds = array<i64: 16, 256>}, {pipeline_mode = #tpu.pipeline_mode<synchronous>, transform_indices = @transform_1, window_bounds = array<i64: 1, 256>}, {pipeline_mode = #tpu.pipeline_mode<synchronous>, transform_indices = @transform_2, window_bounds = array<i64: 1, 128>}, {pipeline_mode = #tpu.pipeline_mode<synchronous>, transform_indices = @transform_3, window_bounds = array<i64: 256, 256>}, {pipeline_mode = #tpu.pipeline_mode<synchronous>, transform_indices = @transform_4, window_bounds = array<i64: 1, 256>}, {pipeline_mode = #tpu.pipeline_mode<synchronous>, transform_indices = @transform_5, window_bounds = array<i64: 256, 128>}, {pipeline_mode = #tpu.pipeline_mode<synchronous>, transform_indices = @transform_6, window_bounds = array<i64: 1, 128>}, {pipeline_mode = #tpu.pipeline_mode<synchronous>, transform_indices = @transform_7, window_bounds = array<i64: 128, 128>}, {pipeline_mode = #tpu.pipeline_mode<synchronous>, transform_indices = @transform_8, window_bounds = array<i64: 1, 128>}, {pipeline_mode = #tpu.pipeline_mode<synchronous>, transform_indices = @transform_9, window_bounds = array<i64: 128, 128>}, {pipeline_mode = #tpu.pipeline_mode<synchronous>, transform_indices = @transform_10, window_bounds = array<i64: 1, 128>}, {transform_indices = @transform_11, window_bounds = array<i64: 16, 128>}]} {
    %c0 = arith.constant 0 : index
    %c0_0 = arith.constant 0 : index
    %0 = vector.load %arg1[%c0, %c0_0] : memref<16x256xf32, #tpu.memory_space<vmem>>, vector<16x256xf32>
    %c0_1 = arith.constant 0 : index
    %c0_2 = arith.constant 0 : index
    %1 = vector.load %arg4[%c0_1, %c0_2] : memref<256x256xf32, #tpu.memory_space<vmem>>, vector<256x256xf32>
    %cst = arith.constant dense<0.000000e+00> : vector<16x256xf32>
    %2 = tpu.matmul %0, %1, %cst {dimension_numbers = #tpu.dot_dimension_numbers<[1], [0], [0], [1], [0, 0, 1, 1], [], []>} : vector<16x256xf32>, vector<256x256xf32>, vector<16x256xf32> -> vector<16x256xf32>
    %c0_3 = arith.constant 0 : index
    %c0_4 = arith.constant 0 : index
    %3 = vector.load %arg5[%c0_3, %c0_4] : memref<1x256xf32, #tpu.memory_space<vmem>>, vector<1x256xf32>
    %4 = vector.broadcast %3 : vector<1x256xf32> to vector<16x256xf32>
    %5 = arith.addf %2, %4 : vector<16x256xf32>
    %cst_5 = arith.constant 0.000000e+00 : f32
    %6 = vector.broadcast %cst_5 : f32 to vector<16x256xf32>
    %7 = arith.maximumf %5, %6 : vector<16x256xf32>
    %c1_i32 = arith.constant 1 : i32
    %8 = tpu.dynamic_rotate %7 by %c1_i32 dim 1 : vector<16x256xf32>, i32 -> vector<16x256xf32>
    %9 = arith.maximumf %7, %8 : vector<16x256xf32>
    %c4_i32 = arith.constant 4 : i32
    %10 = tpu.dynamic_rotate %9 by %c4_i32 dim 1 : vector<16x256xf32>, i32 -> vector<16x256xf32>
    %11 = arith.maximumf %9, %10 : vector<16x256xf32>
    %c0_6 = arith.constant 0 : index
    %c0_7 = arith.constant 0 : index
    %12 = vector.load %arg2[%c0_6, %c0_7] : memref<1x256xf32, #tpu.memory_space<vmem>>, vector<1x256xf32>
    %13 = arith.subf %11, %7 : vector<16x256xf32>
    %14 = vector.broadcast %12 : vector<1x256xf32> to vector<16x256xf32>
    %15 = arith.mulf %14, %13 : vector<16x256xf32>
    %16 = arith.addf %7, %15 : vector<16x256xf32>
    %c0_8 = arith.constant 0 : index
    %c0_9 = arith.constant 0 : index
    %17 = vector.load %arg6[%c0_8, %c0_9] : memref<256x128xf32, #tpu.memory_space<vmem>>, vector<256x128xf32>
    %cst_10 = arith.constant dense<0.000000e+00> : vector<16x128xf32>
    %18 = tpu.matmul %16, %17, %cst_10 {dimension_numbers = #tpu.dot_dimension_numbers<[1], [0], [0], [1], [0, 0, 1, 1], [], []>} : vector<16x256xf32>, vector<256x128xf32>, vector<16x128xf32> -> vector<16x128xf32>
    %c0_11 = arith.constant 0 : index
    %c0_12 = arith.constant 0 : index
    %19 = vector.load %arg7[%c0_11, %c0_12] : memref<1x128xf32, #tpu.memory_space<vmem>>, vector<1x128xf32>
    %20 = vector.broadcast %19 : vector<1x128xf32> to vector<16x128xf32>
    %21 = arith.addf %18, %20 : vector<16x128xf32>
    %cst_13 = arith.constant 0.000000e+00 : f32
    %22 = vector.broadcast %cst_13 : f32 to vector<16x128xf32>
    %23 = arith.maximumf %21, %22 : vector<16x128xf32>
    %c0_14 = arith.constant 0 : index
    %c0_15 = arith.constant 0 : index
    %24 = vector.load %arg8[%c0_14, %c0_15] : memref<128x128xf32, #tpu.memory_space<vmem>>, vector<128x128xf32>
    %cst_16 = arith.constant dense<0.000000e+00> : vector<16x128xf32>
    %25 = tpu.matmul %23, %24, %cst_16 {dimension_numbers = #tpu.dot_dimension_numbers<[1], [0], [0], [1], [0, 0, 1, 1], [], []>} : vector<16x128xf32>, vector<128x128xf32>, vector<16x128xf32> -> vector<16x128xf32>
    %c0_17 = arith.constant 0 : index
    %c0_18 = arith.constant 0 : index
    %26 = vector.load %arg9[%c0_17, %c0_18] : memref<1x128xf32, #tpu.memory_space<vmem>>, vector<1x128xf32>
    %27 = vector.broadcast %26 : vector<1x128xf32> to vector<16x128xf32>
    %28 = arith.addf %25, %27 : vector<16x128xf32>
    %cst_19 = arith.constant 0.000000e+00 : f32
    %29 = vector.broadcast %cst_19 : f32 to vector<16x128xf32>
    %30 = arith.maximumf %28, %29 : vector<16x128xf32>
    %c0_20 = arith.constant 0 : index
    %c0_21 = arith.constant 0 : index
    %31 = vector.load %arg10[%c0_20, %c0_21] : memref<128x128xf32, #tpu.memory_space<vmem>>, vector<128x128xf32>
    %cst_22 = arith.constant dense<0.000000e+00> : vector<16x128xf32>
    %32 = tpu.matmul %30, %31, %cst_22 {dimension_numbers = #tpu.dot_dimension_numbers<[1], [0], [0], [1], [0, 0, 1, 1], [], []>} : vector<16x128xf32>, vector<128x128xf32>, vector<16x128xf32> -> vector<16x128xf32>
    %c0_23 = arith.constant 0 : index
    %c0_24 = arith.constant 0 : index
    %33 = vector.load %arg11[%c0_23, %c0_24] : memref<1x128xf32, #tpu.memory_space<vmem>>, vector<1x128xf32>
    %34 = vector.broadcast %33 : vector<1x128xf32> to vector<16x128xf32>
    %35 = arith.addf %32, %34 : vector<16x128xf32>
    %c0_25 = arith.constant 0 : index
    %c0_26 = arith.constant 0 : index
    %36 = vector.load %arg3[%c0_25, %c0_26] : memref<1x128xf32, #tpu.memory_space<vmem>>, vector<1x128xf32>
    %cst_27 = arith.constant 1.000000e+00 : f32
    %37 = vector.broadcast %cst_27 : f32 to vector<1x128xf32>
    %38 = arith.subf %37, %36 : vector<1x128xf32>
    %cst_28 = arith.constant 1.000000e+30 : f32
    %39 = vector.broadcast %cst_28 : f32 to vector<1x128xf32>
    %40 = arith.mulf %38, %39 : vector<1x128xf32>
    %41 = vector.broadcast %40 : vector<1x128xf32> to vector<16x128xf32>
    %42 = arith.subf %35, %41 : vector<16x128xf32>
    %cst_29 = arith.constant dense<0xFF800000> : vector<16xf32>
    %43 = vector.multi_reduction <maximumf>, %42, %cst_29 [1] : vector<16x128xf32> to vector<16xf32>
    %44 = vector.shape_cast %43 : vector<16xf32> to vector<16x1xf32>
    %45 = vector.broadcast %44 : vector<16x1xf32> to vector<16x128xf32>
    %46 = arith.subf %42, %45 : vector<16x128xf32>
    %47 = math.exp %46 : vector<16x128xf32>
    %cst_30 = arith.constant dense<0.000000e+00> : vector<16xf32>
    %48 = vector.multi_reduction <add>, %47, %cst_30 [1] : vector<16x128xf32> to vector<16xf32>
    %49 = vector.shape_cast %48 : vector<16xf32> to vector<16x1xf32>
    %50 = math.log %49 : vector<16x1xf32>
    %51 = arith.addf %44, %50 : vector<16x1xf32>
    %52 = vector.broadcast %36 : vector<1x128xf32> to vector<16x128xf32>
    %53 = vector.broadcast %51 : vector<16x1xf32> to vector<16x128xf32>
    %54 = arith.mulf %52, %53 : vector<16x128xf32>
    %55 = arith.subf %35, %54 : vector<16x128xf32>
    %c0_31 = arith.constant 0 : index
    %c0_32 = arith.constant 0 : index
    %56 = vector.load %arg12[%c0_31, %c0_32] : memref<16x128xf32, #tpu.memory_space<vmem>>, vector<16x128xf32>
    tpu.vector_store %arg12[%c0_31, %c0_32], %55 {strides = array<i32>} : memref<16x128xf32, #tpu.memory_space<vmem>>, vector<16x128xf32>,
    return
  }
  func.func @transform_0(%arg0: i32) -> (i32, i32) {
    %c0_i32 = arith.constant 0 : i32
    %c0_i32_0 = arith.constant 0 : i32
    return %arg0, %c0_i32 : i32, i32
  }
  func.func @transform_1(%arg0: i32) -> (i32, i32) {
    %c0_i32 = arith.constant 0 : i32
    %c0_i32_0 = arith.constant 0 : i32
    %c0_i32_1 = arith.constant 0 : i32
    return %c0_i32, %c0_i32_0 : i32, i32
  }
  func.func @transform_2(%arg0: i32) -> (i32, i32) {
    %c0_i32 = arith.constant 0 : i32
    %c0_i32_0 = arith.constant 0 : i32
    %c0_i32_1 = arith.constant 0 : i32
    return %c0_i32, %c0_i32_0 : i32, i32
  }
  func.func @transform_3(%arg0: i32) -> (i32, i32) {
    %c0_i32 = arith.constant 0 : i32
    %c0_i32_0 = arith.constant 0 : i32
    %c0_i32_1 = arith.constant 0 : i32
    return %c0_i32, %c0_i32_0 : i32, i32
  }
  func.func @transform_4(%arg0: i32) -> (i32, i32) {
    %c0_i32 = arith.constant 0 : i32
    %c0_i32_0 = arith.constant 0 : i32
    %c0_i32_1 = arith.constant 0 : i32
    return %c0_i32, %c0_i32_0 : i32, i32
  }
  func.func @transform_5(%arg0: i32) -> (i32, i32) {
    %c0_i32 = arith.constant 0 : i32
    %c0_i32_0 = arith.constant 0 : i32
    %c0_i32_1 = arith.constant 0 : i32
    return %c0_i32, %c0_i32_0 : i32, i32
  }
  func.func @transform_6(%arg0: i32) -> (i32, i32) {
    %c0_i32 = arith.constant 0 : i32
    %c0_i32_0 = arith.constant 0 : i32
    %c0_i32_1 = arith.constant 0 : i32
    return %c0_i32, %c0_i32_0 : i32, i32
  }
  func.func @transform_7(%arg0: i32) -> (i32, i32) {
    %c0_i32 = arith.constant 0 : i32
    %c0_i32_0 = arith.constant 0 : i32
    %c0_i32_1 = arith.constant 0 : i32
    return %c0_i32, %c0_i32_0 : i32, i32
  }
  func.func @transform_8(%arg0: i32) -> (i32, i32) {
    %c0_i32 = arith.constant 0 : i32
    %c0_i32_0 = arith.constant 0 : i32
    %c0_i32_1 = arith.constant 0 : i32
    return %c0_i32, %c0_i32_0 : i32, i32
  }
  func.func @transform_9(%arg0: i32) -> (i32, i32) {
    %c0_i32 = arith.constant 0 : i32
    %c0_i32_0 = arith.constant 0 : i32
    %c0_i32_1 = arith.constant 0 : i32
    return %c0_i32, %c0_i32_0 : i32, i32
  }
  func.func @transform_10(%arg0: i32) -> (i32, i32) {
    %c0_i32 = arith.constant 0 : i32
    %c0_i32_0 = arith.constant 0 : i32
    %c0_i32_1 = arith.constant 0 : i32
    return %c0_i32, %c0_i32_0 : i32, i32
  }
  func.func @transform_11(%arg0: i32) -> (i32, i32) {
    %c0_i32 = arith.constant 0 : i32
    %c0_i32_0 = arith.constant 0 : i32
    return %arg0, %c0_i32 : i32, i32
  }
}

</mosaic_0001>

<bundles_post_ra>
// kernel: tpu_custom_call.1
= control target key start
LH: loop header
LB: loop body
LE: loop exit
PB: predicated region body
PF: predicated region fallthrough
CT: control target
= control target key end

     0   :  { %16 = vsyncpa [#allocation3], 0  ;;  %s1391_s0 = inlined_call_operand.hbm [shape: f32[16,256], index: 0, kind: input, shape index: {}]   ;;  %s1392_s1 = inlined_call_operand.vmem [shape: f32[1,256], index: 1, kind: input, shape index: {}]   ;;  %s1393_s2 = inlined_call_operand.vmem [shape: f32[1,128], index: 2, kind: input, shape index: {}]   ;;  %s1394_s3 = inlined_call_operand.hbm [shape: f32[256,256], index: 3, kind: input, shape index: {}]   ;;  %s1395_s4 = inlined_call_operand.vmem [shape: f32[1,256], index: 4, kind: input, shape index: {}]   ;;  %s1396_s5 = inlined_call_operand.hbm [shape: f32[256,128], index: 5, kind: input, shape index: {}]   ;;  %s1397_s6 = inlined_call_operand.vmem [shape: f32[1,128], index: 6, kind: input, shape index: {}]   ;;  %s1398_s7 = inlined_call_operand.hbm [shape: f32[128,128], index: 7, kind: input, shape index: {}]   ;;  %s1399_s8 = inlined_call_operand.vmem [shape: f32[1,128], index: 8, kind: input, shape index: {}]   ;;  %s1400_s9 = inlined_call_operand.hbm [shape: f32[128,128], index: 9, kind: input, shape index: {}]   ;;  %s1401_s10 = inlined_call_operand.vmem [shape: f32[1,128], index: 10, kind: input, shape index: {}]   ;;  %s1402_s11 = inlined_call_operand.hbm [shape: f32[16,128], index: 11, kind: output, shape index: {}]  }
   0x1   :  { %17 = vsyncpa [#allocation6], 0 }
   0x2   :  { %18 = vsyncpa [#allocation9], 0 }
   0x3   :  { %19 = vsyncpa [#allocation4], 0  ;;  %s1171_s17 = smov [#allocation5]   ;;  %s1031_s21 = scalar_lea.hbm %s1394_s3, 8192 }
   0x4   :  { %s41_s18 = sshll.u32 %s1171_s17, 4  ;;  %p1032_p0 = scmp.ne.s32.totalorder %s1394_s3, %s1031_s21  ;;  %s42_s18 = int_to_ptr.vmem [resolvable:$true] %s41_s18 }
   0x5   :  { %p1035_p1 = scmp.lt.u32.totalorder %s1031_s21, %s1394_s3 }
   0x7   :  { %p1037_p2 = pnand %p1035_p1, %p1032_p0 }
   0x9   :  { %1040 = shalt.err (!%p1037_p2)
}
   0xa   :  { %s1041_s26 = scalar_lea.vmem %s42_s18, 8192  ;;  %p1046_p4 = scmp.lt.s32.totalorder %s42_s18, %s42_s18 }
   0xb   :  { %p1042_p3 = scmp.ne.s32.totalorder %s42_s18, %s1041_s26  ;;  %p1047_p5 = scmp.lt.s32.totalorder %s1041_s26, %s1041_s26 }
   0xd   :  { %p1048_p6 = por %p1047_p5, %p1046_p4 }
   0xf   :  { %p1049_p7 = pnand %p1048_p6, %p1042_p3 }
  0x11   :  { %1052 = shalt.err (!%p1049_p7)
}
  0x12   :  { %s1172_s27 = smov 256   ;;  %s1173_s28 = smov 16  }
  0x13   :  { %47 = dma.hbm_to_vmem [thread:$0]  %s1394_s3, 8192, %s42_s18, [#allocation6], %s1172_s27, %s1172_s27, %s1173_s28  }
  0x14   :  { %s1174_s12 = smov [#allocation8]   ;;  %s1175_s14 = smov [#allocation2]  }
  0x15   :  { %s69_s13 = sshll.u32 %s1174_s12, 4  ;;  %s25_s15 = sshll.u32 %s1175_s14, 4  ;;  %s70_s13 = int_to_ptr.vmem [resolvable:$true] %s69_s13  ;;  %s26_s15 = int_to_ptr.vmem [resolvable:$true] %s25_s15 }
  0x16   :  { %s1053_s19 = scalar_lea.hbm %s1398_s7, 2048 }
  0x17   :  { %p1054_p8 = scmp.ne.s32.totalorder %s1398_s7, %s1053_s19  ;;  %p1057_p9 = scmp.lt.u32.totalorder %s1053_s19, %s1398_s7 }
  0x19   :  { %p1059_p10 = pnand %p1057_p9, %p1054_p8 }
  0x1b   :  { %1062 = shalt.err (!%p1059_p10)
}
  0x1c   :  { %s1063_s3 = scalar_lea.vmem %s70_s13, 2048  ;;  %p1068_p12 = scmp.lt.s32.totalorder %s70_s13, %s70_s13 }
  0x1d   :  { %p1064_p11 = scmp.ne.s32.totalorder %s70_s13, %s1063_s3  ;;  %p1069_p13 = scmp.lt.s32.totalorder %s1063_s3, %s1063_s3 }
  0x1f   :  { %p1070_p0 = por %p1069_p13, %p1068_p12 }
  0x21   :  { %p1071_p1 = pnand %p1070_p0, %p1064_p11 }
  0x23   :  { %1074 = shalt.err (!%p1071_p1)
}
  0x24   :  { %s1176_s18 = smov 128   ;;  %s1177_s24 = smov 8  }
  0x25   :  { %75 = dma.hbm_to_vmem [thread:$0]  %s1398_s7, 2048, %s70_s13, [#allocation9], %s1176_s18, %s1176_s18, %s1177_s24  }
  0x26   :  { %s1075_s12 = scalar_lea.hbm %s1391_s0, 512 }
  0x27   :  { %p1076_p2 = scmp.ne.s32.totalorder %s1391_s0, %s1075_s12  ;;  %p1079_p3 = scmp.lt.u32.totalorder %s1075_s12, %s1391_s0 }
  0x29   :  { %p1081_p4 = pnand %p1079_p3, %p1076_p2 }
  0x2b   :  { %1084 = shalt.err (!%p1081_p4)
}
  0x2c   :  { %s1085_s20 = scalar_lea.vmem %s26_s15, 512  ;;  %p1090_p6 = scmp.lt.s32.totalorder %s26_s15, %s26_s15 }
  0x2d   :  { %p1086_p5 = scmp.ne.s32.totalorder %s26_s15, %s1085_s20  ;;  %p1091_p7 = scmp.lt.s32.totalorder %s1085_s20, %s1085_s20 }
  0x2f   :  { %p1092_p8 = por %p1091_p7, %p1090_p6 }
  0x31   :  { %p1093_p9 = pnand %p1092_p8, %p1086_p5 }
  0x33   :  { %1096 = shalt.err (!%p1093_p9)
}
  0x34   :  { %31 = dma.hbm_to_vmem [thread:$0]  %s1391_s0, 512, %s26_s15, [#allocation3], %s1172_s27, %s1172_s27, %s1173_s28  }
  0x35   :  { %s1178_s21 = smov [#allocation7]   ;;  %s1179_s23 = smov [#allocation10]  }
  0x36   :  { %s55_s22 = sshll.u32 %s1178_s21, 4  ;;  %s83_s3 = sshll.u32 %s1179_s23, 4  ;;  %s56_s22 = int_to_ptr.vmem [resolvable:$true] %s55_s22  ;;  %s84_s3 = int_to_ptr.vmem [resolvable:$true] %s83_s3 }
  0x37   :  { %s1097_s29 = scalar_lea.hbm %s1396_s5, 4096 }
  0x38   :  { %p1098_p10 = scmp.ne.s32.totalorder %s1396_s5, %s1097_s29  ;;  %p1101_p11 = scmp.lt.u32.totalorder %s1097_s29, %s1396_s5 }
  0x3a   :  { %p1103_p12 = pnand %p1101_p11, %p1098_p10 }
  0x3c   :  { %1106 = shalt.err (!%p1103_p12)
}
  0x3d   :  { %s1107_s0 = scalar_lea.vmem %s56_s22, 4096  ;;  %p1112_p0 = scmp.lt.s32.totalorder %s56_s22, %s56_s22 }
  0x3e   :  { %p1108_p13 = scmp.ne.s32.totalorder %s56_s22, %s1107_s0  ;;  %p1113_p1 = scmp.lt.s32.totalorder %s1107_s0, %s1107_s0 }
  0x40   :  { %p1114_p2 = por %p1113_p1, %p1112_p0 }
  0x42   :  { %p1115_p3 = pnand %p1114_p2, %p1108_p13 }
  0x44   :  { %1118 = shalt.err (!%p1115_p3)
}
  0x45   :  { %61 = dma.hbm_to_vmem [thread:$0]  %s1396_s5, 4096, %s56_s22, [#allocation6], %s1176_s18, %s1176_s18, %s1177_s24  }
  0x46   :  { %s1119_s19 = scalar_lea.hbm %s1400_s9, 2048 }
  0x47   :  { %p1120_p4 = scmp.ne.s32.totalorder %s1400_s9, %s1119_s19  ;;  %p1123_p5 = scmp.lt.u32.totalorder %s1119_s19, %s1400_s9 }
  0x49   :  { %p1125_p6 = pnand %p1123_p5, %p1120_p4 }
  0x4b   :  { %1128 = shalt.err (!%p1125_p6)
}
  0x4c   :  { %s1129_s23 = scalar_lea.vmem %s84_s3, 2048  ;;  %p1134_p8 = scmp.lt.s32.totalorder %s84_s3, %s84_s3 }
  0x4d   :  { %p1130_p7 = scmp.ne.s32.totalorder %s84_s3, %s1129_s23  ;;  %p1135_p9 = scmp.lt.s32.totalorder %s1129_s23, %s1129_s23 }
  0x4f   :  { %p1136_p10 = por %p1135_p9, %p1134_p8 }
  0x51   :  { %p1137_p11 = pnand %p1136_p10, %p1130_p7 }
  0x53   :  { %1140 = shalt.err (!%p1137_p11)
}
  0x54   :  { %89 = dma.hbm_to_vmem [thread:$0]  %s1400_s9, 2048, %s84_s3, [#allocation9], %s1176_s18, %s1176_s18, %s1177_s24  }
  0x55   :  { %1163 = dma.done.wait [#allocation3], 512  }
  0x56   :  { %1164 = vsyncadd [#allocation3], 4294966784 }
  0x57   :  { %1165 = dma.done.wait [#allocation6], 12288  }
  0x58   :  { %1166 = vsyncadd [#allocation6], 4294955008 }
  0x59   :  { %1167 = dma.done.wait [#allocation9], 4096  }
  0x5a   :  { %1168 = vsyncadd [#allocation9], 4294963200  ;;  %v112_v0 = vld [vmem:[#allocation5 + $0x8] sm:$0xff]  ;;  %v114_v1 = vld [vmem:[#allocation5 + $0x18] sm:$0xff]  ;;  %s1181_s25 = smov 4  }
  0x5b   :  { %v111_v2 = vld [vmem:[#allocation5] sm:$0xff]  ;;  %v851_v3 = vpack.c.bf16 %v114_v1, %v112_v0  ;;  %v113_v4 = vld [vmem:[#allocation5 + $0x10] sm:$0xff]  ;;  %v116_v5 = vld [vmem:[#allocation5 + $0x28] sm:$0xff] }
  0x5c   :  { %v118_v6 = vld [vmem:[#allocation5 + $0x38] sm:$0xff]  ;;  %v853_v7 = vpack.c.bf16 %v113_v4, %v111_v2  ;;  %v115_v9 = vld [vmem:[#allocation5 + $0x20] sm:$0xff]  ;;  %v117_v10 = vld [vmem:[#allocation5 + $0x30] sm:$0xff] }
  0x5d   :  { %v855_v8 = vpack.c.bf16 %v118_v6, %v116_v5  ;;  %v120_v11 = vld [vmem:[#allocation5 + $0x48] sm:$0xff]  ;;  %852 = vmatprep.subr.bf16.mxu0 %v851_v3  ;;  %v122_v12 = vld [vmem:[#allocation5 + $0x58] sm:$0xff]  ;;  %v857_v13 = vpack.c.bf16 %v117_v10, %v115_v9  ;;  %v119_v15 = vld [vmem:[#allocation5 + $0x40] sm:$0xff] }
  0x5e   :  { %854 = vmatpush1.bf16.msra.mxu0 %v853_v7  ;;  %v859_v14 = vpack.c.bf16 %v122_v12, %v120_v11  ;;  %v121_v16 = vld [vmem:[#allocation5 + $0x50] sm:$0xff]  ;;  %v124_v17 = vld [vmem:[#allocation5 + $0x68] sm:$0xff]  ;;  %v126_v18 = vld [vmem:[#allocation5 + $0x78] sm:$0xff] }
  0x5f   :  { %856 = vmatprep.subr.bf16.mxu0 %v855_v8  ;;  %v861_v19 = vpack.c.bf16 %v121_v16, %v119_v15  ;;  %v863_v20 = vpack.c.bf16 %v126_v18, %v124_v17  ;;  %v123_v21 = vld [vmem:[#allocation5 + $0x60] sm:$0xff]  ;;  %v125_v22 = vld [vmem:[#allocation5 + $0x70] sm:$0xff]  ;;  %v128_v23 = vld [vmem:[#allocation5 + $0x88] sm:$0xff] }
  0x60   :  { %v130_v24 = vld [vmem:[#allocation5 + $0x98] sm:$0xff]  ;;  %v865_v25 = vpack.c.bf16 %v125_v22, %v123_v21  ;;  %v127_v27 = vld [vmem:[#allocation5 + $0x80] sm:$0xff]  ;;  %v129_v28 = vld [vmem:[#allocation5 + $0x90] sm:$0xff] }
  0x61   :  { %v867_v26 = vpack.c.bf16 %v130_v24, %v128_v23  ;;  %v132_v29 = vld [vmem:[#allocation5 + $0xa8] sm:$0xff]  ;;  %v134_v30 = vld [vmem:[#allocation5 + $0xb8] sm:$0xff]  ;;  %v869_v31 = vpack.c.bf16 %v129_v28, %v127_v27  ;;  %v131_v33 = vld [vmem:[#allocation5 + $0xa0] sm:$0xff] }
  0x62   :  { %858 = vmatpush1.bf16.msra.mxu0 %v857_v13  ;;  %v871_v32 = vpack.c.bf16 %v134_v30, %v132_v29  ;;  %v133_v34 = vld [vmem:[#allocation5 + $0xb0] sm:$0xff]  ;;  %v136_v35 = vld [vmem:[#allocation5 + $0xc8] sm:$0xff]  ;;  %v138_v36 = vld [vmem:[#allocation5 + $0xd8] sm:$0xff] }
  0x63   :  { %860 = vmatprep.subr.bf16.mxu0 %v859_v14  ;;  %v873_v37 = vpack.c.bf16 %v133_v34, %v131_v33  ;;  %v875_v38 = vpack.c.bf16 %v138_v36, %v136_v35  ;;  %v135_v39 = vld [vmem:[#allocation5 + $0xc0] sm:$0xff]  ;;  %v137_v40 = vld [vmem:[#allocation5 + $0xd0] sm:$0xff]  ;;  %v108_v41 = vld [vmem:[#allocation2 + $0x8] sm:$0xff]  ;;  %v177_v36 = vlaneseq }
  0x64   :  { %v140_v42 = vld [vmem:[#allocation5 + $0xe8] sm:$0xff]  ;;  %v142_v43 = vld [vmem:[#allocation5 + $0xf8] sm:$0xff]  ;;  %251 = vmatprep.mubr.f32.mxu0 %v108_v41  ;;  %v877_v44 = vpack.c.bf16 %v137_v40, %v135_v39  ;;  %v139_v46 = vld [vmem:[#allocation5 + $0xe0] sm:$0xff] }
  0x65   :  { %v879_v45 = vpack.c.bf16 %v142_v43, %v140_v42  ;;  %v141_v47 = vld [vmem:[#allocation5 + $0xf0] sm:$0xff]  ;;  %v144_v48 = vld [vmem:[#allocation5 + $0x108] sm:$0xff]  ;;  %v146_v49 = vld [vmem:[#allocation5 + $0x118] sm:$0xff] }
  0x66   :  { %862 = vmatpush1.bf16.msra.mxu0 %v861_v19  ;;  %v881_v50 = vpack.c.bf16 %v141_v47, %v139_v46  ;;  %v883_v51 = vpack.c.bf16 %v146_v49, %v144_v48  ;;  %v143_v52 = vld [vmem:[#allocation5 + $0x100] sm:$0xff]  ;;  %v145_v53 = vld [vmem:[#allocation5 + $0x110] sm:$0xff]  ;;  %v148_v54 = vld [vmem:[#allocation5 + $0x128] sm:$0xff] }
  0x67   :  { %864 = vmatprep.subr.bf16.mxu0 %v863_v20  ;;  %v150_v55 = vld [vmem:[#allocation5 + $0x138] sm:$0xff]  ;;  %v885_v56 = vpack.c.bf16 %v145_v53, %v143_v52  ;;  %v147_v58 = vld [vmem:[#allocation5 + $0x120] sm:$0xff]  ;;  %v149_v59 = vld [vmem:[#allocation5 + $0x130] sm:$0xff] }
  0x68   :  { %v887_v57 = vpack.c.bf16 %v150_v55, %v148_v54  ;;  %v152_v60 = vld [vmem:[#allocation5 + $0x148] sm:$0xff]  ;;  %v154_v61 = vld [vmem:[#allocation5 + $0x158] sm:$0xff]  ;;  %v889_v62 = vpack.c.bf16 %v149_v59, %v147_v58  ;;  %v151_v0 = vld [vmem:[#allocation5 + $0x140] sm:$0xff] }
  0x69   :  { %v891_v63 = vpack.c.bf16 %v154_v61, %v152_v60  ;;  %v153_v1 = vld [vmem:[#allocation5 + $0x150] sm:$0xff]  ;;  %v156_v2 = vld [vmem:[#allocation5 + $0x168] sm:$0xff]  ;;  %v158_v3 = vld [vmem:[#allocation5 + $0x178] sm:$0xff] }
  0x6a   :  { %866 = vmatpush1.bf16.msra.mxu0 %v865_v25  ;;  %v893_v4 = vpack.c.bf16 %v153_v1, %v151_v0  ;;  %v895_v5 = vpack.c.bf16 %v158_v3, %v156_v2  ;;  %v155_v6 = vld [vmem:[#allocation5 + $0x160] sm:$0xff]  ;;  %v157_v7 = vld [vmem:[#allocation5 + $0x170] sm:$0xff]  ;;  %v160_v8 = vld [vmem:[#allocation5 + $0x188] sm:$0xff] }
  0x6b   :  { %868 = vmatprep.subr.bf16.mxu0 %v867_v26  ;;  %v162_v9 = vld [vmem:[#allocation5 + $0x198] sm:$0xff]  ;;  %v897_v10 = vpack.c.bf16 %v157_v7, %v155_v6  ;;  %v159_v12 = vld [vmem:[#allocation5 + $0x180] sm:$0xff]  ;;  %v161_v13 = vld [vmem:[#allocation5 + $0x190] sm:$0xff] }
  0x6c   :  { %v899_v11 = vpack.c.bf16 %v162_v9, %v160_v8  ;;  %v164_v14 = vld [vmem:[#allocation5 + $0x1a8] sm:$0xff]  ;;  %v166_v15 = vld [vmem:[#allocation5 + $0x1b8] sm:$0xff]  ;;  %v901_v16 = vpack.c.bf16 %v161_v13, %v159_v12  ;;  %v163_v18 = vld [vmem:[#allocation5 + $0x1a0] sm:$0xff] }
  0x6d   :  { %v903_v17 = vpack.c.bf16 %v166_v15, %v164_v14  ;;  %v165_v19 = vld [vmem:[#allocation5 + $0x1b0] sm:$0xff]  ;;  %v168_v20 = vld [vmem:[#allocation5 + $0x1c8] sm:$0xff]  ;;  %v170_v21 = vld [vmem:[#allocation5 + $0x1d8] sm:$0xff] }
  0x6e   :  { %870 = vmatpush1.bf16.msra.mxu0 %v869_v31  ;;  %v905_v22 = vpack.c.bf16 %v165_v19, %v163_v18  ;;  %v907_v23 = vpack.c.bf16 %v170_v21, %v168_v20  ;;  %v167_v24 = vld [vmem:[#allocation5 + $0x1c0] sm:$0xff]  ;;  %v169_v25 = vld [vmem:[#allocation5 + $0x1d0] sm:$0xff]  ;;  %v172_v26 = vld [vmem:[#allocation5 + $0x1e8] sm:$0xff] }
  0x6f   :  { %872 = vmatprep.subr.bf16.mxu0 %v871_v32  ;;  %v174_v27 = vld [vmem:[#allocation5 + $0x1f8] sm:$0xff]  ;;  %v909_v28 = vpack.c.bf16 %v169_v25, %v167_v24  ;;  %v171_v30 = vld [vmem:[#allocation5 + $0x1e0] sm:$0xff]  ;;  %v173_v31 = vld [vmem:[#allocation5 + $0x1f0] sm:$0xff] }
  0x70   :  { %v911_v29 = vpack.c.bf16 %v174_v27, %v172_v26  ;;  %v913_v32 = vpack.c.bf16 %v173_v31, %v171_v30  ;;  %v107_v33 = vld [vmem:[#allocation2] sm:$0xff]  ;;  %v110_v34 = vld [vmem:[#allocation2 + $0x18] sm:$0xff]  ;;  %v109_v35 = vld [vmem:[#allocation2 + $0x10] sm:$0xff] }
  0x71   :  { %v175_v39 = vld [vmem:[%s1395_s4] sm:$0x3]  ;;  %v345_v49 = vld [vmem:[#allocation7 + $0x88] sm:$0xff]  ;;  %v346_v54 = vld [vmem:[#allocation7 + $0x90] sm:$0xff]  ;;  %s1180_s4 = smov 1  }
  0x72   :  { %874 = vmatpush1.bf16.msra.mxu0 %v873_v37  ;;  %v1319_v37 = vshrl.u32 %v177_v36, 7  ;;  %v344_v48 = vld [vmem:[#allocation7 + $0x80] sm:$0xff]  ;;  %v329_v53 = vld [vmem:[#allocation7 + $0x8] sm:$0xff]  ;;  %v347_v55 = vld [vmem:[#allocation7 + $0x98] sm:$0xff] }
  0x73   :  { %876 = vmatprep.subr.bf16.mxu0 %v875_v38  ;;  %v915_v52 = vpack.c.bf16 %v345_v49, %v344_v48  ;;  %v919_v59 = vpack.c.bf16 %v347_v55, %v346_v54  ;;  %v330_v60 = vld [vmem:[#allocation7 + $0x10] sm:$0xff]  ;;  %v331_v61 = vld [vmem:[#allocation7 + $0x18] sm:$0xff]  ;;  %v333_v6 = vld [vmem:[#allocation7 + $0x28] sm:$0xff] }
  0x74   :  { %v1322_v38 = vsub.s32 0, %v1319_v37  ;;  %v183_v40 = vsub.s32 1, %v1319_v37  ;;  %v921_v3 = vpack.c.bf16 %v331_v61, %v330_v60  ;;  %v350_v7 = vld [vmem:[#allocation7 + $0xb0] sm:$0xff]  ;;  %v351_v8 = vld [vmem:[#allocation7 + $0xb8] sm:$0xff]  ;;  %v352_v14 = vld [vmem:[#allocation7 + $0xc0] sm:$0xff] }
  0x75   :  { %916 = vmatprep.subr.bf16.mxu1 %v915_v52  ;;  %v334_v12 = vld [vmem:[#allocation7 + $0x30] sm:$0xff]  ;;  %v335_v13 = vld [vmem:[#allocation7 + $0x38] sm:$0xff]  ;;  %v353_v15 = vld [vmem:[#allocation7 + $0xc8] sm:$0xff] }
  0x76   :  { %878 = vmatpush1.bf16.msra.mxu0 %v877_v44  ;;  %v180_v41 = vrot.slane %v175_v39, %v1322_v38  ;;  %v184_v42 = vrot.slane %v175_v39, %v183_v40  ;;  %v336_v18 = vld [vmem:[#allocation7 + $0x40] sm:$0xff]  ;;  %v337_v19 = vld [vmem:[#allocation7 + $0x48] sm:$0xff]  ;;  %v354_v20 = vld [vmem:[#allocation7 + $0xd0] sm:$0xff] }
  0x77   :  { %880 = vmatprep.subr.bf16.mxu0 %v879_v45  ;;  %v355_v21 = vld [vmem:[#allocation7 + $0xd8] sm:$0xff]  ;;  %v338_v24 = vld [vmem:[#allocation7 + $0x50] sm:$0xff]  ;;  %v356_v27 = vld [vmem:[#allocation7 + $0xe0] sm:$0xff] }
  0x78   :  { %v339_v25 = vld [vmem:[#allocation7 + $0x58] sm:$0xff]  ;;  %v340_v30 = vld [vmem:[#allocation7 + $0x60] sm:$0xff]  ;;  %v341_v31 = vld [vmem:[#allocation7 + $0x68] sm:$0xff] }
  0x79   :  { %v937_v26 = vpack.c.bf16 %v339_v25, %v338_v24  ;;  %v444_v54 = vld [vmem:[#allocation8] sm:$0xff]  ;;  %v445_v55 = vld [vmem:[#allocation8 + $0x8] sm:$0xff] }
  0x7a   :  { %882 = vmatpush1.bf16.msra.mxu0 %v881_v50  ;;  %v328_v50 = vld [vmem:[#allocation7] sm:$0xff]  ;;  %v449_v25 = vld [vmem:[#allocation8 + $0x28] sm:$0xff] }
  0x7b   :  { %884 = vmatprep.subr.bf16.mxu0 %v883_v51  ;;  %v917_v58 = vpack.c.bf16 %v329_v53, %v328_v50  ;;  %v448_v24 = vld [vmem:[#allocation8 + $0x20] sm:$0xff] }
  0x7d   :  { %918 = vmatpush3.bf16.msra.mxu1 %v917_v58  ;;  %v947_v58 = vpack.c.bf16 %v445_v55, %v444_v54  ;;  %v551_v54 = vld [vmem:[#allocation10 + $0x38] sm:$0xff] }
  0x7e   :  { %886 = vmatpush1.bf16.msra.mxu0 %v885_v56  ;;  %920 = vmatprep.subr.bf16.mxu1 %v919_v59  ;;  %v304_v59 = vld [vmem:[%s1392_s1] sm:$0x3] }
  0x7f   :  { %888 = vmatprep.subr.bf16.mxu0 %v887_v57 }
  0x81   :  { %922 = vmatpush3.bf16.msra.mxu1 %v921_v3 }
  0x82   :  { %890 = vmatpush1.bf16.msra.mxu0 %v889_v62  ;;  %v348_v62 = vld [vmem:[#allocation7 + $0xa0] sm:$0xff] }
  0x83   :  { %892 = vmatprep.subr.bf16.mxu0 %v891_v63  ;;  %v349_v63 = vld [vmem:[#allocation7 + $0xa8] sm:$0xff] }
  0x86   :  { %894 = vmatpush1.bf16.msra.mxu0 %v893_v4  ;;  %v923_v4 = vpack.c.bf16 %v349_v63, %v348_v62 }
  0x87   :  { %896 = vmatprep.subr.bf16.mxu0 %v895_v5  ;;  %v332_v5 = vld [vmem:[#allocation7 + $0x20] sm:$0xff] }
  0x88   :  { %924 = vmatprep.subr.bf16.mxu1 %v923_v4  ;;  %v313_v4 = vrot.slane %v304_v59, %v1322_v38 }
  0x8a   :  { %898 = vmatpush1.bf16.msra.mxu0 %v897_v10  ;;  %v925_v10 = vpack.c.bf16 %v333_v6, %v332_v5  ;;  %v317_v5 = vrot.slane %v304_v59, %v183_v40  ;;  %v554_v59 = vld [vmem:[#allocation10 + $0x50] sm:$0xff] }
  0x8b   :  { %900 = vmatprep.subr.bf16.mxu0 %v899_v11  ;;  %v927_v11 = vpack.c.bf16 %v351_v8, %v350_v7 }
  0x8c   :  { %926 = vmatpush3.bf16.msra.mxu1 %v925_v10 }
  0x8d   :  { %928 = vmatprep.subr.bf16.mxu1 %v927_v11 }
  0x8e   :  { %902 = vmatpush1.bf16.msra.mxu0 %v901_v16  ;;  %v929_v16 = vpack.c.bf16 %v335_v13, %v334_v12 }
  0x8f   :  { %904 = vmatprep.subr.bf16.mxu0 %v903_v17  ;;  %v931_v17 = vpack.c.bf16 %v353_v15, %v352_v14 }
  0x90   :  { %930 = vmatpush3.bf16.msra.mxu1 %v929_v16 }
  0x91   :  { %932 = vmatprep.subr.bf16.mxu1 %v931_v17  ;;  %v446_v17 = vld [vmem:[#allocation8 + $0x10] sm:$0xff] }
  0x92   :  { %906 = vmatpush1.bf16.msra.mxu0 %v905_v22  ;;  %v933_v22 = vpack.c.bf16 %v337_v19, %v336_v18  ;;  %v447_v18 = vld [vmem:[#allocation8 + $0x18] sm:$0xff] }
  0x93   :  { %908 = vmatprep.subr.bf16.mxu0 %v907_v23  ;;  %v935_v23 = vpack.c.bf16 %v355_v21, %v354_v20  ;;  %v951_v21 = vpack.c.bf16 %v447_v18, %v446_v17  ;;  %v705_v18 = vld [vmem:[%s1399_s8] ss:$0 sm:$0xff] }
  0x94   :  { %934 = vmatpush3.bf16.msra.mxu1 %v933_v22 }
  0x95   :  { %936 = vmatprep.subr.bf16.mxu1 %v935_v23 }
  0x96   :  { %910 = vmatpush1.bf16.msra.mxu0 %v909_v28  ;;  %v357_v28 = vld [vmem:[#allocation7 + $0xe8] sm:$0xff] }
  0x97   :  { %912 = vmatprep.subr.bf16.mxu0 %v911_v29  ;;  %v939_v29 = vpack.c.bf16 %v357_v28, %v356_v27  ;;  %v955_v28 = vpack.c.bf16 %v449_v25, %v448_v24 }
  0x98   :  { %938 = vmatpush3.bf16.msra.mxu1 %v937_v26 }
  0x99   :  { %940 = vmatprep.subr.bf16.mxu1 %v939_v29  ;;  %v450_v29 = vld [vmem:[#allocation8 + $0x30] sm:$0xff] }
  0x9a   :  { %914 = vmatpush1.bf16.msra.mxu0 %v913_v32  ;;  %v941_v32 = vpack.c.bf16 %v341_v31, %v340_v30  ;;  %v451_v30 = vld [vmem:[#allocation8 + $0x38] sm:$0xff]  ;;  %v453_v31 = vld [vmem:[#allocation8 + $0x48] sm:$0xff] }
  0x9c   :  { %942 = vmatpush3.bf16.msra.mxu1 %v941_v32 }
  0x9d   :  { %252 = vmatmul.mubr.f32.vlgmr.msra.gmra.mrb[0].mxu0 %v107_v33  ;;  %v277_v33 = vand.u32 127, %v177_v36 }
  0x9e   :  { %257 = vmatprep.mubr.f32.mxu0 %v110_v34  ;;  %v358_v34 = vld [vmem:[#allocation7 + $0xf0] sm:$0xff] }
  0x9f   :  { %vm278_vm0 = vcmp.lt.s32.totalorder %v277_v33, 1  ;;  %vm295_vm1 = vcmp.lt.s32.totalorder %v277_v33, 4 }
  0xa1   :  { %258 = vmatmul.mubr.f32.gmra.mrb[2].mxu0 %v109_v35  ;;  %v359_v35 = vld [vmem:[#allocation7 + $0xf8] sm:$0xff] }
  0xa2   :  { %v943_v39 = vpack.c.bf16 %v359_v35, %v358_v34  ;;  %v456_v34 = vld [vmem:[#allocation8 + $0x60] sm:$0xff]  ;;  %v457_v35 = vld [vmem:[#allocation8 + $0x68] sm:$0xff] }
  0xa4   :  { %944 = vmatprep.subr.bf16.mxu1 %v943_v39  ;;  %v971_v39 = vpack.c.bf16 %v457_v35, %v456_v34 }
 0x170   :  { %v253_v43 = vpop.f32.mrb[0].mxu0 }
 0x171   :  { %v254_v44 = vadd.f32 %v253_v43, %v180_v41  ;;  %v255_v45 = vpop.f32.mrb[1].mxu0 }
 0x172   :  { %v256_v47 = vadd.f32 %v255_v45, %v184_v42 }
 0x173   :  { %v1331_v46 = vmax.f32 %v254_v44, 0.0 }
 0x174   :  { %v259_v51 = vpop.f32.mrb[2].mxu0  ;;  %v1334_v0 = vmax.f32 %v256_v47, 0.0 }
 0x175   :  { %v260_v56 = vadd.f32 %v259_v51, %v180_v41  ;;  %v261_v57 = vpop.f32.mrb[3].mxu0  ;;  %268 = vrot.lane.b32.xlu0 %v1331_v46, %s1180_s4  ;;  %v342_v41 = vld [vmem:[#allocation7 + $0x70] sm:$0xff] }
 0x176   :  { %v262_v2 = vadd.f32 %v261_v57, %v184_v42  ;;  %v343_v42 = vld [vmem:[#allocation7 + $0x78] sm:$0xff] }
 0x177   :  { %v1336_v1 = vmax.f32 %v260_v56, 0.0  ;;  %v945_v44 = vpack.c.bf16 %v343_v42, %v342_v41  ;;  %v458_v41 = vld [vmem:[#allocation8 + $0x70] sm:$0xff]  ;;  %v459_v42 = vld [vmem:[#allocation8 + $0x78] sm:$0xff] }
 0x178   :  { %v1340_v9 = vmax.f32 %v262_v2, 0.0 }
 0x179   :  { %270 = vrot.lane.b32.xlu1 %v1336_v1, %s1180_s4  ;;  %272 = vrot.lane.b32.xlu0 %v1334_v0, %s1180_s4 }
 0x17a   :  { %946 = vmatpush3.bf16.msra.mxu1 %v945_v44  ;;  %v544_v44 = vld [vmem:[#allocation10] sm:$0xff] }
 0x17b   :  { %948 = vmatprep.subr.bf16.mxu1 %v947_v58 }
 0x17d   :  { %274 = vrot.lane.b32.xlu1 %v1340_v9, %s1180_s4 }
 0x1e7   :  { %v269_v43 = vpop.permute.xlu0 %268 }
 0x1eb   :  { %v271_v45 = vpop.permute.xlu1 %270  ;;  %v273_v47 = vpop.permute.xlu0 %272 }
 0x1ec   :  { %v279_v48 = vsel %vm278_vm0, %v269_v43, %v273_v47  ;;  %v281_v49 = vsel %vm278_vm0, %v273_v47, %v269_v43  ;;  %v975_v43 = vpack.c.bf16 %v459_v42, %v458_v41  ;;  %v546_v47 = vld [vmem:[#allocation10 + $0x10] sm:$0xff] }
 0x1ed   :  { %v283_v50 = vmax.f32 %v1331_v46, %v281_v49  ;;  %v284_v51 = vmax.f32 %v1334_v0, %v279_v48  ;;  %v547_v49 = vld [vmem:[#allocation10 + $0x18] sm:$0xff] }
 0x1ef   :  { %v275_v36 = vpop.permute.xlu1 %274  ;;  %287 = vrot.lane.b32.xlu0 %v283_v50, %s1181_s25  ;;  %291 = vrot.lane.b32.xlu1 %v284_v51, %s1181_s25 }
 0x1f0   :  { %v280_v52 = vsel %vm278_vm0, %v271_v45, %v275_v36  ;;  %v282_v53 = vsel %vm278_vm0, %v275_v36, %v271_v45  ;;  %v545_v45 = vld [vmem:[#allocation10 + $0x8] sm:$0xff] }
 0x1f1   :  { %v285_v56 = vmax.f32 %v1336_v1, %v282_v53  ;;  %v286_v57 = vmax.f32 %v1340_v9, %v280_v52  ;;  %v979_v48 = vpack.c.bf16 %v545_v45, %v544_v44  ;;  %v549_v36 = vld [vmem:[#allocation10 + $0x28] sm:$0xff]  ;;  %v550_v53 = vld [vmem:[#allocation10 + $0x30] sm:$0xff] }
 0x1f2   :  { %v991_v55 = vpack.c.bf16 %v551_v54, %v550_v53 }
 0x1f3   :  { %289 = vrot.lane.b32.xlu0 %v285_v56, %s1181_s25  ;;  %293 = vrot.lane.b32.xlu1 %v286_v57, %s1181_s25 }
 0x1f4   :  { %980 = vmatprep.subr.bf16.mxu0 %v979_v48 }
 0x1f5   :  { %982 = vmatpush3.bf16.msra.mxu0 %v979_v48 }
 0x261   :  { %v288_v60 = vpop.permute.xlu0 %287  ;;  %v292_v61 = vpop.permute.xlu1 %291 }
 0x262   :  { %v296_v62 = vsel %vm295_vm1, %v288_v60, %v292_v61  ;;  %v298_v63 = vsel %vm295_vm1, %v292_v61, %v288_v60  ;;  %v555_v60 = vld [vmem:[#allocation10 + $0x58] sm:$0xff] }
 0x263   :  { %v300_v2 = vmax.f32 %v283_v50, %v298_v63  ;;  %v301_v3 = vmax.f32 %v284_v51, %v296_v62  ;;  %v983_v50 = vpack.c.bf16 %v547_v49, %v546_v47  ;;  %v548_v51 = vld [vmem:[#allocation10 + $0x20] sm:$0xff]  ;;  %v999_v61 = vpack.c.bf16 %v555_v60, %v554_v59  ;;  %v557_v63 = vld [vmem:[#allocation10 + $0x68] sm:$0xff] }
 0x264   :  { %v987_v52 = vpack.c.bf16 %v549_v36, %v548_v51  ;;  %v556_v62 = vld [vmem:[#allocation10 + $0x60] sm:$0xff] }
 0x265   :  { %v305_v6 = vsub.f32 %v300_v2, %v1331_v46  ;;  %v290_v7 = vpop.permute.xlu0 %289  ;;  %v294_v8 = vpop.permute.xlu1 %293  ;;  %v306_v10 = vsub.f32 %v301_v3, %v1334_v0  ;;  %984 = vmatprep.subr.bf16.mxu0 %v983_v50  ;;  %v1003_v2 = vpack.c.bf16 %v557_v63, %v556_v62 }
 0x266   :  { %v297_v11 = vsel %vm295_vm1, %v290_v7, %v294_v8  ;;  %v299_v12 = vsel %vm295_vm1, %v294_v8, %v290_v7  ;;  %986 = vmatpush3.bf16.msra.mxu0 %v983_v50 }
 0x267   :  { %v302_v13 = vmax.f32 %v285_v56, %v299_v12  ;;  %v303_v14 = vmax.f32 %v286_v57, %v297_v11  ;;  %v321_v15 = vmul.f32 %v317_v5, %v306_v10  ;;  %v320_v16 = vmul.f32 %v313_v4, %v305_v6  ;;  %988 = vmatprep.subr.bf16.mxu0 %v987_v52  ;;  %v552_v56 = vld [vmem:[#allocation10 + $0x40] sm:$0xff]  ;;  %v553_v57 = vld [vmem:[#allocation10 + $0x48] sm:$0xff] }
 0x269   :  { %v307_v19 = vsub.f32 %v302_v13, %v1336_v1  ;;  %v308_v20 = vsub.f32 %v303_v14, %v1340_v9  ;;  %v325_v37 = vadd.f32 %v321_v15, %v1334_v0  ;;  %v324_v40 = vadd.f32 %v320_v16, %v1331_v46  ;;  %v452_v0 = vld [vmem:[#allocation8 + $0x40] sm:$0xff]  ;;  %v558_v15 = vld [vmem:[#allocation10 + $0x70] sm:$0xff]  ;;  %v559_v16 = vld [vmem:[#allocation10 + $0x78] sm:$0xff] }
 0x26a   :  { %v959_v46 = vpack.c.bf16 %v451_v30, %v450_v29  ;;  %v963_v32 = vpack.c.bf16 %v453_v31, %v452_v0  ;;  %990 = vmatpush3.bf16.msra.mxu0 %v987_v52  ;;  %v1007_v17 = vpack.c.bf16 %v559_v16, %v558_v15 }
 0x26b   :  { %431 = vmatprep.mubr.f32.mxu1 %v325_v37  ;;  %v323_v22 = vmul.f32 %v317_v5, %v308_v20  ;;  %v322_v23 = vmul.f32 %v313_v4, %v307_v19  ;;  %992 = vmatprep.subr.bf16.mxu0 %v991_v55  ;;  %v704_v4 = vld [vmem:[%s1397_s6] ss:$0 sm:$0xff] }
 0x26c   :  { %432 = vmatmul.mubr.f32.vlgmr.msra.gmra.mrb[0].mxu1 %v324_v40 }
 0x26d   :  { %v327_v26 = vadd.f32 %v323_v22, %v1340_v9  ;;  %v326_v27 = vadd.f32 %v322_v23, %v1336_v1  ;;  %950 = vmatpush3.bf16.msra.mxu1 %v947_v58  ;;  %v454_v9 = vld [vmem:[#allocation8 + $0x50] sm:$0xff]  ;;  %v455_v1 = vld [vmem:[#allocation8 + $0x58] sm:$0xff]  ;;  %v995_v58 = vpack.c.bf16 %v553_v57, %v552_v56  ;;  %v642_v23 = vld [vmem:[%s1393_s2] sm:$0x1]  ;;  %s1182_s2 = smov [#allocation11]  }
 0x26e   :  { %952 = vmatprep.subr.bf16.mxu1 %v951_v21  ;;  %v967_v33 = vpack.c.bf16 %v455_v1, %v454_v9  ;;  %994 = vmatpush3.bf16.msra.mxu0 %v991_v55  ;;  %v643_v24 = vsub.f32 1.0, %v642_v23  ;;  %v677_v45 = vrot.slane %v642_v23, %v1322_v38  ;;  %s690_s8 = sshll.u32 %s1182_s2, 4  ;;  %s691_s8 = int_to_ptr.vmem [resolvable:$true] %s690_s8 }
 0x26f   :  { %436 = vmatprep.mubr.f32.mxu1 %v327_v26  ;;  %996 = vmatprep.subr.bf16.mxu0 %v995_v58  ;;  %v706_v26 = vld [vmem:[%s1401_s10] ss:$0 sm:$0xff]  ;;  %s1141_s10 = scalar_lea.vmem %s691_s8, 256  ;;  %p1146_p13 = scmp.lt.s32.totalorder %s691_s8, %s691_s8 }
 0x270   :  { %437 = vmatmul.mubr.f32.gmra.mrb[2].mxu1 %v326_v27  ;;  %v644_v25 = vmul.f32 1e+30, %v643_v24  ;;  %p1142_p12 = scmp.ne.s32.totalorder %s691_s8, %s1141_s10  ;;  %p1147_p0 = scmp.lt.s32.totalorder %s1141_s10, %s1141_s10 }
 0x271   :  { %954 = vmatpush3.bf16.msra.mxu1 %v951_v21 }
 0x272   :  { %956 = vmatprep.subr.bf16.mxu1 %v955_v28  ;;  %998 = vmatpush3.bf16.msra.mxu0 %v995_v58  ;;  %v649_v27 = vrot.slane %v644_v25, %v1322_v38  ;;  %p1148_p1 = por %p1147_p0, %p1146_p13 }
 0x273   :  { %1000 = vmatprep.subr.bf16.mxu0 %v999_v61 }
 0x274   :  { %p1149_p2 = pnand %p1148_p1, %p1142_p12 }
 0x275   :  { %958 = vmatpush3.bf16.msra.mxu1 %v955_v28 }
 0x276   :  { %960 = vmatprep.subr.bf16.mxu1 %v959_v46  ;;  %1002 = vmatpush3.bf16.msra.mxu0 %v999_v61 }
 0x277   :  { %1004 = vmatprep.subr.bf16.mxu0 %v1003_v2 }
 0x279   :  { %962 = vmatpush3.bf16.msra.mxu1 %v959_v46 }
 0x27a   :  { %964 = vmatprep.subr.bf16.mxu1 %v963_v32  ;;  %1006 = vmatpush3.bf16.msra.mxu0 %v1003_v2 }
 0x27b   :  { %1008 = vmatprep.subr.bf16.mxu0 %v1007_v17 }
 0x27d   :  { %966 = vmatpush3.bf16.msra.mxu1 %v963_v32 }
 0x27e   :  { %968 = vmatprep.subr.bf16.mxu1 %v967_v33  ;;  %1010 = vmatpush3.bf16.msra.mxu0 %v1007_v17 }
 0x281   :  { %970 = vmatpush3.bf16.msra.mxu1 %v967_v33 }
 0x282   :  { %972 = vmatprep.subr.bf16.mxu1 %v971_v39 }
 0x285   :  { %974 = vmatpush3.bf16.msra.mxu1 %v971_v39 }
 0x286   :  { %976 = vmatprep.subr.bf16.mxu1 %v975_v43 }
 0x289   :  { %978 = vmatpush3.bf16.msra.mxu1 %v975_v43 }
 0x33f   :  { %v739_v3 = vpop.f32.mrb[0].mxu1 }
 0x340   :  { %v740_v5 = vpop.f32.mrb[1].mxu1 }
 0x341   :  { %v741_v6 = vadd.f32 %v740_v5, %v739_v3 }
 0x343   :  { %v434_v7 = vadd.f32 %v741_v6, %v704_v4  ;;  %v742_v8 = vpop.f32.mrb[2].mxu1 }
 0x344   :  { %v743_v10 = vpop.f32.mrb[3].mxu1 }
 0x345   :  { %v442_v11 = vmax.f32 %v434_v7, 0.0  ;;  %v744_v12 = vadd.f32 %v743_v10, %v742_v8 }
 0x347   :  { %v439_v13 = vadd.f32 %v744_v12, %v704_v4  ;;  %813 = vmatprep.mubr.f32.mxu1 %v442_v11 }
 0x349   :  { %v443_v14 = vmax.f32 %v439_v13, 0.0 }
 0x34b   :  { %814 = vmatmul.mubr.f32.vlgmr.msra.gmra.mrb[4].mxu1 %v443_v14 }
 0x41e   :  { %v815_v19 = vpop.f32.mrb[4].mxu1 }
 0x41f   :  { %v539_v20 = vadd.f32 %v815_v19, %v705_v18  ;;  %v533_v37 = vpop.f32.mrb[5].mxu1 }
 0x420   :  { %v534_v40 = vadd.f32 %v705_v18, %v533_v37 }
 0x421   :  { %v543_v22 = vmax.f32 %v539_v20, 0.0 }
 0x422   :  { %v542_v21 = vmax.f32 %v534_v40, 0.0 }
 0x424   :  { %848 = vmatprep.mubr.f32.mxu0 %v542_v21 }
 0x425   :  { %849 = vmatmul.mubr.f32.vlgmr.msra.gmra.mrb[4].mxu0 %v543_v22 }
 0x4f8   :  { %v850_v28 = vpop.f32.mrb[4].mxu0 }
 0x4f9   :  { %v639_v29 = vadd.f32 %v850_v28, %v706_v26  ;;  %v633_v30 = vpop.f32.mrb[5].mxu0 }
 0x4fa   :  { %v634_v46 = vadd.f32 %v706_v26, %v633_v30 }
 0x4fb   :  { %v652_v0 = vsub.f32 %v639_v29, %v649_v27 }
 0x4fc   :  { %v651_v31 = vsub.f32 %v634_v46, %v649_v27 }
 0x4fd   :  { %655 = vmax.xlane.f32.xlu1 %v652_v0 }
 0x4fe   :  { %653 = vmax.xlane.f32.xlu0 %v651_v31 }
 0x58a   :  { %v656_v32 = vpop.xlane.xlu1 %655 }
 0x58b   :  { %v654_v9 = vpop.xlane.xlu0 %653  ;;  %v658_v1 = vsub.f32 %v652_v0, %v656_v32 }
 0x58c   :  { %v657_v33 = vsub.f32 %v651_v31, %v654_v9 }
 0x58d   :  { %v661_v35 = vmul.f32 1.442695, %v658_v1 }
 0x58e   :  { %v659_v34 = vmul.f32 1.442695, %v657_v33 }
 0x590   :  { %1023 = vpow2.f32 %v659_v34 }
 0x591   :  { %1025 = vpow2.f32 %v661_v35 }
 0x59a   :  { %v1024_v39 = vpop.eup %1023 }
 0x59b   :  { %663 = vadd.xlane.f32.xlu0 %v1024_v39  ;;  %v1026_v41 = vpop.eup %1025 }
 0x59f   :  { %665 = vadd.xlane.f32.xlu0 %v1026_v41 }
 0x628   :  { %v664_v42 = vpop.xlane.xlu0 %663 }
 0x629   :  { %1027 = vlog2.f32 %v664_v42 }
 0x62c   :  { %v666_v43 = vpop.xlane.xlu0 %665 }
 0x62d   :  { %1029 = vlog2.f32 %v666_v43 }
 0x633   :  { %v1028_v44 = vpop.eup %1027 }
 0x634   :  { %v668_v47 = vmul.f32 0.6931472, %v1028_v44 }
 0x636   :  { %v671_v48 = vadd.f32 %v668_v47, %v654_v9 }
 0x637   :  { %v1030_v49 = vpop.eup %1029 }
 0x638   :  { %v679_v50 = vmul.f32 %v677_v45, %v671_v48  ;;  %v670_v51 = vmul.f32 0.6931472, %v1030_v49 }
 0x63a   :  { %v672_v36 = vadd.f32 %v670_v51, %v656_v32  ;;  %v681_v52 = vsub.f32 %v634_v46, %v679_v50 }
 0x63c   :  { %v680_v53 = vmul.f32 %v677_v45, %v672_v36  ;;  %683 = vst [vmem:[#allocation11] sm:$0xff] %v681_v52 }
 0x63e   :  { %v682_v54 = vsub.f32 %v639_v29, %v680_v53 }
 0x640   :  { %684 = vst [vmem:[#allocation11 + $0x8] sm:$0xff] %v682_v54 }
 0x641   :  { %1152 = shalt.err (!%p1149_p2)
}
 0x642   :  { %s1153_s17 = scalar_lea.hbm %s1402_s11, 256 }
 0x643   :  { %p1154_p3 = scmp.ne.s32.totalorder %s1402_s11, %s1153_s17  ;;  %p1157_p4 = scmp.lt.u32.totalorder %s1153_s17, %s1402_s11 }
 0x645   :  { %p1159_p5 = pnand %p1157_p4, %p1154_p3 }
 0x647   :  { %1162 = shalt.err (!%p1159_p5)
}
 0x648   :  { %696 = dma.vmem_to_hbm [thread:$0]  %s691_s8, 256, %s1402_s11, [#allocation4], %s1176_s18, %s1176_s18, %s1177_s24  }
 0x649   :  { %1169 = dma.done.wait [#allocation4], 256  }
 0x64a   :  { %1170 = vsyncadd [#allocation4], 4294967040 }
 0x64b   :  { %700 = vsyncpa [#allocation3], 1 }
 0x64c   :  { %701 = vsyncpa [#allocation6], 1 }
 0x64d   :  { %702 = vsyncpa [#allocation9], 1 }
 0x64e   :  { %703 = vsyncpa [#allocation4], 1 }

</bundles_post_ra>
